<compile_context>
chip_gen: v7x
topology: tpu7x:2x2x1
jax: 0.10.0
libtpu: 0.0.40
codegen_flags: <defaults>
</compile_context>

<pallas_src>
import jax
import jax.numpy as jnp
from jax.experimental import pallas as pl
from jax.experimental.pallas import tpu as pltpu


# ----------------------------------------------------------------------------
# Kernel
# ----------------------------------------------------------------------------
def _make_kernel(c_x, compute_dtype, split_store):
    """Build the gates kernel.

    c_x           : number of x channels (static)
    compute_dtype : dtype of the pointwise (1+gl)*x / (1+gl)*g path
    split_store   : True -> two aligned stores (C sublane-aligned)
                    False -> single concatenated dense store
    """

    def kernel(shift_ref, w_ref, x_ref, g_ref, o_ref):
        # shift_ref : SMEM (1,)      folded BN shift (beta - mean * scale), f32
        # w_ref     : VMEM (C, 1)    1x1-conv weight column, pre-scaled by BN scale, f32
        # x_ref     : VMEM (C,  T)
        # g_ref     : VMEM (Cg, T)
        # o_ref     : VMEM (C+Cg, T)
        x_in = x_ref[...]
        g_in = g_ref[...]
        w = w_ref[...]                                          # (C, 1), f32

        # 1x1 conv with a single output channel == per-lane weighted sum over
        # channels: VPU multiply + sublane reduction (XLU). Gate math in f32.
        gl_raw = jnp.sum(w * x_in.astype(jnp.float32), axis=0, keepdims=True)  # (1, T)
        z = gl_raw + shift_ref[0]                               # folded BN (inference)
        mult = 1.0 + jax.nn.sigmoid(z)                          # (1, T), f32
        mult = mult.astype(compute_dtype)

        # Pointwise path in compute_dtype (input dtype on v6e/v7x, f32 on v5e/f32
        # inputs) -- avoids full-tile f32 temporaries for bf16 inputs.
        p1 = (mult * x_in.astype(compute_dtype)).astype(o_ref.dtype)   # (C,  T)
        p2 = (mult * g_in.astype(compute_dtype)).astype(o_ref.dtype)   # (Cg, T)

        if split_store:
            # C is a multiple of the sublane pack -> two unmasked dense stores,
            # no concatenate temporary.
            o_ref[:c_x, :] = p1
            o_ref[c_x:, :] = p2
        else:
            # Misaligned C: assemble once and issue a single dense store.
            o_ref[...] = jnp.concatenate([p1, p2], axis=0)

    return kernel


# ----------------------------------------------------------------------------
# Sizing helpers
# ----------------------------------------------------------------------------
def _is_v5e():
    try:
        kind = jax.devices()[0].device_kind.lower()
    except Exception:
        return False
    return ("v5 lite" in kind) or ("v5e" in kind) or ("v5litepod" in kind)


def _vmem_capacity_bytes():
    try:
        info = pltpu.get_tpu_info()
        return int(getattr(info, "vmem_capacity_bytes", 64 << 20))
    except Exception:
        return 64 << 20   # conservative (v7x per-TC VMEM)


def _per_lane_bytes(c_x, c_g, itemsize, comp_itemsize, split_store):
    """Bytes of VMEM needed per output lane of one grid step (I/O + temps)."""
    c_tot = c_x + c_g
    # double-buffered pipeline tiles: x + g inputs and the output, 2 buffers each
    per_lane = 4 * c_tot * itemsize
    # in-kernel intermediates (p1/p2 + slack for the gate product / casts)
    per_lane += 3 * c_tot * max(comp_itemsize, itemsize)
    # f32 upcasts feeding the gate reduction (and the v5e fallback path)
    if itemsize < 4:
        per_lane += 4 * c_x
        if comp_itemsize == 4:
            per_lane += 4 * c_g
    if not split_store:
        per_lane += c_tot * itemsize              # concatenate temporary
    return per_lane


def _choose_lane_tile(hw, per_lane_bytes, target, vmem_budget):
    """Largest lane tile T (multiple of 128) whose per-step VMEM footprint
    stays under vmem_budget. If HW is a multiple of 128, T also divides HW;
    otherwise the wrapper pads HW up to n_t * T."""
    cap = max(128, (vmem_budget // max(per_lane_bytes, 1)) // 128 * 128)
    t = max(128, (min(target, cap) // 128) * 128)
    if hw % 128 == 0:
        t = min(t, hw)
        while hw % t != 0:          # terminates at 128 since hw % 128 == 0
            t -= 128
        return t
    # HW not a multiple of 128: wrapper pads; keep T no larger than padded HW
    return min(t, pl.cdiv(hw, 128) * 128)


# ----------------------------------------------------------------------------
# Public wrapper
# ----------------------------------------------------------------------------
def gates_block(x, g, conv_w, bn_gamma, bn_beta, bn_mean, bn_var, eps=1e-5,
                target_lane_tile=2048):
    """x: (N, C, H, W), g: (N, Cg, H, W) — NCHW as in PyTorch."""
    N, C, H, W = x.shape
    Cg = g.shape[1]
    HW = H * W

    out_dtype = x.dtype
    itemsize = jnp.dtype(x.dtype).itemsize

    # Pointwise compute dtype: input dtype on bf16-capable parts, f32 on v5e
    # (no bf16 VALU) or when the inputs are already f32.
    if jnp.dtype(x.dtype) == jnp.dtype(jnp.float32) or _is_v5e():
        compute_dtype = jnp.float32
    else:
        compute_dtype = x.dtype
    comp_itemsize = jnp.dtype(compute_dtype).itemsize

    # Sublane pack: 8 for 32-bit, 16 for bf16, 32 for 8-bit.
    pack = (8 * 4) // itemsize
    split_store = (C % pack == 0)

    # Generation-aware VMEM budget (half of physical, capped at 64 MiB).
    capacity = _vmem_capacity_bytes()
    budget = max(16 << 20, min(capacity // 2, 64 << 20))

    per_lane = _per_lane_bytes(C, Cg, itemsize, comp_itemsize, split_store)
    T = _choose_lane_tile(HW, per_lane, target_lane_tile, budget)
    n_t = pl.cdiv(HW, T)
    HW_pad = n_t * T

    x2 = x.reshape(N, C, HW)
    g2 = g.reshape(N, Cg, HW)
    if HW_pad != HW:
        # Pad the lane axis up to a multiple of T; padded lanes are sliced off
        # at the end (their gate value is harmless garbage that never escapes).
        pad = HW_pad - HW
        x2 = jnp.pad(x2, ((0, 0), (0, 0), (0, pad)))
        g2 = jnp.pad(g2, ((0, 0), (0, 0), (0, pad)))

    # Fold BN (inference) into the conv weight / a single shift scalar.
    bn_scale = (jnp.asarray(bn_gamma, jnp.float32)
                / jnp.sqrt(jnp.asarray(bn_var, jnp.float32) + eps))
    bn_shift = (jnp.asarray(bn_beta, jnp.float32)
                - jnp.asarray(bn_mean, jnp.float32) * bn_scale)
    w_col = conv_w.reshape(C, 1).astype(jnp.float32) * bn_scale       # (C, 1)
    shift = jnp.reshape(bn_shift, (1,)).astype(jnp.float32)           # (1,)

    # Declared VMEM limit covers the real per-step footprint, never exceeds
    # the device's physical VMEM (minus headroom).
    needed = per_lane * T + (4 << 20)
    vmem_limit = int(max(16 << 20, min(max(needed, budget), capacity - (8 << 20))))

    # Deeper buffering only when there are many small steps (per-step DMA
    # issue latency otherwise un-hidden); skip when tiles are already big.
    steps = n_t * N
    tile_bytes = (C + Cg) * T * itemsize
    deep = (steps >= 4) and (tile_bytes < (512 << 10))

    def _io_spec(block, idx):
        if deep:
            return pl.BlockSpec(block, idx, pipeline_mode=pl.Buffered(3))
        return pl.BlockSpec(block, idx)

    kernel = _make_kernel(C, compute_dtype, split_store)

    out = pl.pallas_call(
        kernel,
        out_shape=jax.ShapeDtypeStruct((N, C + Cg, HW_pad), out_dtype),
        grid_spec=pltpu.PrefetchScalarGridSpec(
            num_scalar_prefetch=1,                 # shift -> SMEM
            grid=(n_t, N),                         # spatial tiles first (v7x megacore)
            in_specs=[
                pl.BlockSpec((C, 1), lambda t, n, s: (0, 0)),              # weight column
                _io_spec((None, C, T), lambda t, n, s: (n, 0, t)),         # x tile
                _io_spec((None, Cg, T), lambda t, n, s: (n, 0, t)),        # g tile
            ],
            out_specs=pl.BlockSpec((None, C + Cg, T), lambda t, n, s: (n, 0, t)),
        ),
        compiler_params=pltpu.CompilerParams(
            dimension_semantics=("parallel", "parallel"),
            vmem_limit_bytes=vmem_limit,
        ),
    )(shift, w_col, x2, g2)

    if HW_pad != HW:
        out = out[:, :, :HW]
    return out.reshape(N, C + Cg, H, W)


# ----------------------------------------------------------------------------
# Pure-JAX reference (mirrors the PyTorch forward, inference-mode BN)
# ----------------------------------------------------------------------------
def _reference(x, g, conv_w, bn_gamma, bn_beta, bn_mean, bn_var, eps=1e-5):
    xf = x.astype(jnp.float32)
    gf = g.astype(jnp.float32)
    w = conv_w.reshape(-1).astype(jnp.float32)
    gl_raw = jnp.einsum("c,nchw->nhw", w, xf)[:, None]          # (N,1,H,W)
    z = (gl_raw - bn_mean) / jnp.sqrt(bn_var + eps) * bn_gamma + bn_beta
    gl = jax.nn.sigmoid(z)
    p1 = (1.0 + gl) * xf
    p2 = (1.0 + gl) * gf
    return jnp.concatenate([p1, p2], axis=1)


if __name__ == "__main__":
    key = jax.random.PRNGKey(0)

    def run_case(N, C, Cg, H, W, dtype, atol, rtol):
        ks = jax.random.split(jax.random.fold_in(key, N * 1000 + C * 100 + H), 3)
        x = jax.random.normal(ks[0], (N, C, H, W), dtype=jnp.float32).astype(dtype)
        g = jax.random.normal(ks[1], (N, Cg, H, W), dtype=jnp.float32).astype(dtype)
        conv_w = jax.random.normal(ks[2], (1, C, 1, 1), dtype=jnp.float32) * 0.1
        bn_gamma = jnp.float32(1.1)
        bn_beta = jnp.float32(0.05)
        bn_mean = jnp.float32(0.02)
        bn_var = jnp.float32(0.9)

        out = gates_block(x, g, conv_w, bn_gamma, bn_beta, bn_mean, bn_var)
        out = jax.block_until_ready(out)

        ref = _reference(x, g, conv_w, bn_gamma, bn_beta, bn_mean, bn_var)
        assert out.shape == (N, C + Cg, H, W), out.shape
        assert jnp.allclose(out.astype(jnp.float32), ref, atol=atol, rtol=rtol), \
            f"mismatch vs reference for case {(N, C, Cg, H, W, str(dtype))}"

    # 1) base case: C not sublane-aligned -> single concatenated dense store
    run_case(2, 4, 4, 16, 16, jnp.float32, 1e-5, 1e-5)
    # 2) sublane-aligned C (f32 pack=8) -> two aligned stores, no concat temp
    run_case(1, 8, 8, 16, 16, jnp.float32, 1e-5, 1e-5)
    # 3) HW not a multiple of 128 -> padded lane tile + final slice
    run_case(2, 4, 4, 10, 10, jnp.float32, 1e-5, 1e-5)
    # 4) bf16 inputs: pointwise path in input dtype (f32 fallback on v5e)
    run_case(1, 16, 16, 16, 16, jnp.bfloat16, 1e-1, 1e-1)

    print("KERNEL_OK")
</pallas_src>

<mosaic_0001>
module attributes {stable_mosaic.version = 11 : i64} {
  func.func @kernel(%arg0: i32, %arg1: i32, %arg2: memref<1xf32, #tpu.memory_space<smem>>, %arg3: memref<4x1xf32, #tpu.memory_space<vmem>>, %arg4: memref<1x4x256xf32, #tpu.memory_space<vmem>>, %arg5: memref<1x4x256xf32, #tpu.memory_space<vmem>>, %arg6: memref<1x8x256xf32, #tpu.memory_space<vmem>>) attributes {dimension_semantics = [#tpu.dimension_semantics<parallel>, #tpu.dimension_semantics<parallel>], iteration_bounds = array<i64: 1, 2>, scalar_prefetch = 1 : i64, scratch_operands = 0 : i64, tpu.core_type = #tpu.core_type<tc>, window_params = [{pipeline_mode = #tpu.pipeline_mode<synchronous>, transform_indices = @transform_0, window_bounds = array<i64: 4, 1>}, {transform_indices = @transform_1, window_bounds = array<i64: 1, 4, 256>}, {transform_indices = @transform_2, window_bounds = array<i64: 1, 4, 256>}, {transform_indices = @transform_3, window_bounds = array<i64: 1, 8, 256>}]} {
    %c0 = arith.constant 0 : index
    %c0_0 = arith.constant 0 : index
    %c0_1 = arith.constant 0 : index
    %0 = vector.load %arg4[%c0, %c0_0, %c0_1] : memref<1x4x256xf32, #tpu.memory_space<vmem>>, vector<1x4x256xf32>
    %1 = vector.shape_cast %0 : vector<1x4x256xf32> to vector<4x256xf32>
    %c0_2 = arith.constant 0 : index
    %c0_3 = arith.constant 0 : index
    %c0_4 = arith.constant 0 : index
    %2 = vector.load %arg5[%c0_2, %c0_3, %c0_4] : memref<1x4x256xf32, #tpu.memory_space<vmem>>, vector<1x4x256xf32>
    %3 = vector.shape_cast %2 : vector<1x4x256xf32> to vector<4x256xf32>
    %c0_5 = arith.constant 0 : index
    %c0_6 = arith.constant 0 : index
    %4 = vector.load %arg3[%c0_5, %c0_6] : memref<4x1xf32, #tpu.memory_space<vmem>>, vector<4x1xf32>
    %5 = vector.broadcast %4 : vector<4x1xf32> to vector<4x256xf32>
    %6 = arith.mulf %5, %1 : vector<4x256xf32>
    %cst = arith.constant dense<0.000000e+00> : vector<256xf32>
    %7 = vector.multi_reduction <add>, %6, %cst [0] : vector<4x256xf32> to vector<256xf32>
    %8 = vector.shape_cast %7 : vector<256xf32> to vector<1x256xf32>
    %c0_7 = arith.constant 0 : index
    %9 = memref.load %arg2[%c0_7] : memref<1xf32, #tpu.memory_space<smem>>
    %10 = vector.broadcast %9 : f32 to vector<1x256xf32>
    %11 = arith.addf %8, %10 : vector<1x256xf32>
    %12 = arith.negf %11 : vector<1x256xf32>
    %13 = math.exp %12 : vector<1x256xf32>
    %cst_8 = arith.constant 1.000000e+00 : f32
    %14 = vector.broadcast %cst_8 : f32 to vector<1x256xf32>
    %15 = arith.addf %14, %13 : vector<1x256xf32>
    %16 = arith.divf %14, %15 : vector<1x256xf32>
    %cst_9 = arith.constant 1.000000e+00 : f32
    %17 = vector.broadcast %cst_9 : f32 to vector<1x256xf32>
    %18 = arith.addf %17, %16 : vector<1x256xf32>
    %19 = vector.broadcast %18 : vector<1x256xf32> to vector<4x256xf32>
    %20 = arith.mulf %19, %1 : vector<4x256xf32>
    %21 = vector.broadcast %18 : vector<1x256xf32> to vector<4x256xf32>
    %22 = arith.mulf %21, %3 : vector<4x256xf32>
    %23 = tpu.concatenate %20, %22 in 0 : vector<4x256xf32>, vector<4x256xf32> -> vector<8x256xf32>
    %c0_10 = arith.constant 0 : index
    %c0_11 = arith.constant 0 : index
    %c0_12 = arith.constant 0 : index
    %24 = vector.load %arg6[%c0_10, %c0_11, %c0_12] : memref<1x8x256xf32, #tpu.memory_space<vmem>>, vector<1x8x256xf32>
    %25 = vector.shape_cast %24 : vector<1x8x256xf32> to vector<8x256xf32>
    %26 = vector.shape_cast %23 : vector<8x256xf32> to vector<1x8x256xf32>
    tpu.vector_store %arg6[%c0_10, %c0_11, %c0_12], %26 {strides = array<i32>} : memref<1x8x256xf32, #tpu.memory_space<vmem>>, vector<1x8x256xf32>,
    return
  }
  func.func @transform_0(%arg0: i32, %arg1: i32, %arg2: memref<1xf32, #tpu.memory_space<smem>>) -> (i32, i32) {
    %c0_i32 = arith.constant 0 : i32
    %c0_i32_0 = arith.constant 0 : i32
    %c0_i32_1 = arith.constant 0 : i32
    return %c0_i32, %c0_i32_0 : i32, i32
  }
  func.func @transform_1(%arg0: i32, %arg1: i32, %arg2: memref<1xf32, #tpu.memory_space<smem>>) -> (i32, i32, i32) {
    %c0_i32 = arith.constant 0 : i32
    %c0_i32_0 = arith.constant 0 : i32
    return %arg1, %c0_i32, %arg0 : i32, i32, i32
  }
  func.func @transform_2(%arg0: i32, %arg1: i32, %arg2: memref<1xf32, #tpu.memory_space<smem>>) -> (i32, i32, i32) {
    %c0_i32 = arith.constant 0 : i32
    %c0_i32_0 = arith.constant 0 : i32
    return %arg1, %c0_i32, %arg0 : i32, i32, i32
  }
  func.func @transform_3(%arg0: i32, %arg1: i32, %arg2: memref<1xf32, #tpu.memory_space<smem>>) -> (i32, i32, i32) {
    %c0_i32 = arith.constant 0 : i32
    %c0_i32_0 = arith.constant 0 : i32
    return %arg1, %c0_i32, %arg0 : i32, i32, i32
  }
}

</mosaic_0001>

<bundles_post_ra>
// kernel: tpu_custom_call.1
= control target key start
LH: loop header
LB: loop body
LE: loop exit
PB: predicated region body
PF: predicated region fallthrough
CT: control target
= control target key end

     0   :  { %s853_s0 = inlined_call_operand.<no memory space> [shape: f32[1], index: 0, kind: input, shape index: {}]   ;;  %s854_s1 = inlined_call_operand.vmem [shape: f32[4,1], index: 1, kind: input, shape index: {}]   ;;  %s855_s2 = inlined_call_operand.hbm [shape: f32[2,4,256], index: 2, kind: input, shape index: {}]   ;;  %s856_s3 = inlined_call_operand.vmem [shape: f32[2,4,256], index: 3, kind: input, shape index: {}]   ;;  %s857_s4 = inlined_call_operand.hbm [shape: f32[2,8,256], index: 4, kind: output, shape index: {}]  }
   0x1   :  { %9 = sst [smem:[#allocation3]] %s853_s0 }
   0x2   :  { %10 = vsyncpa [#allocation5], 0 }
   0x3   :  { %12 = vsyncpa [#allocation5 + $0x1], 0 }
   0x4   :  { %13 = vsyncpa [#allocation6], 0 }
   0x5   :  { %15 = vsyncpa [#allocation6 + $0x1], 0  ;;  %s668_s17 = smov 0   ;;  %s670_s18 = smov 0  }
   0x6   :  { %s672_s19 = smov 0   ;;  %s674_s20 = smov 0  }
   0x7   :  { %s676_s21 = smov 0   ;;  %s678_s22 = smov 0  }
   0x8 LB: > { %s427_s0 = sadd.s32 4294967295, %s635_s22   ;;  %s428_s23 = sadd.s32 4294967294, %s635_s22   ;;  %s635_s22 = sphi %s678_s22, %s21_s22   ;;  %s631_s21 = sphi %s676_s21, %s873_s21   ;;  %s627_s20 = sphi %s674_s20, %s872_s20   ;;  %s623_s19 = sphi %s672_s19, %s871_s19   ;;  %s619_s18 = sphi %s670_s18, %s870_s18   ;;  %s615_s17 = sphi %s668_s17, %s869_s17  }
   0x9   : > { %s30_s24 = sadd.s32 1, %s631_s21  ;;  %s63_s25 = sadd.s32 1, %s623_s19 }
   0xa   : > { %p31_p0 = scmp.ge.s32.totalorder %s30_s24, 2  ;;  %p70_p1 = scmp.ne.s32.totalorder %s623_s19, %s619_s18 }
   0xb   : > { %p71_p2 = scmp.eq.s32.totalorder %s635_s22, 0  ;;  %p76_p3 = scmp.ne.s32.totalorder %s619_s18, %s615_s17 }
   0xc   : > { %s875_s24 = smov (%p31_p0, %s30_s24), 0  ;;  %p77_p5 = scmp.eq.s32.totalorder %s427_s0, 0 }
   0xd   : > { %p709_p4 = por %p71_p2, %p70_p1  ;;  %s58_s27 = ssub.s32 %s631_s21, %s875_s24 }
   0xe   : > { %p130_p6 = scmp.eq.s32.totalorder %s427_s0, 1  ;;  %p61_p7 = scmp.eq.s32.totalorder %s58_s27, 0 }
   0xf   : > { %p715_p8 = por %p77_p5, %p76_p3  ;;  %p136_p10 = scmp.eq.s32.totalorder %s428_s23, 1 }
  0x10   : > { %p719_p9 = por %p130_p6, %p70_p1  ;;  %p461_p13 = scmp.lt.s32.totalorder %s635_s22, 2 }
  0x11   : > { %s724_s30 = scalar_select %p61_p7, %s623_s19, %s63_s25  }
  0x12   : > { %s861_s29 = scalar_select %p719_p9, 1, 0 }
  0x13   : > { %p726_p11 = por %p136_p10, %p76_p3  ;;  %s159_s6 = sand.u32 1, %s623_s19  }
  0x14   : > { %s431_s7 = sshll.u32 %s159_s6, 3  ;;  %s446_s8 = sshll.u32 %s631_s21, 7 }
  0x15   : > { %s862_s5 = scalar_select %p726_p11, 1, 0 }
  0x16   : > { %s737_s11 = scalar_lea.hbm %s855_s2, %s446_s8  ;;  %s163_s12 = scalar_lea.vmem [#allocation4], %s431_s7 }
  0x17   : > { %s173_s13 = sshll.u32 %s163_s12, 4  ;;  %p743_p0 = pnand %p461_p13, %p709_p4  ;;  %s739_s13 = int_to_ptr.vmem [resolvable:$true] %s173_s13 }
  0x18   : > { %s160_s15 = scalar_lea.sflag [#allocation5], %s159_s6  ;;  %s523_s16 = scalar_lea.hbm %s737_s11, 128 }
  0x19   : > { %p524_p3 = scmp.ne.s32.totalorder %s737_s11, %s523_s16  ;;  %p525_p5 = pneg %p743_p0 }
  0x1a   : > { %s528_s25 = scalar_lea.hbm %s855_s2, 256  ;;  %p529_p4 = scmp.lt.u32.totalorder %s737_s11, %s855_s2 }
  0x1b   : > { %p526_p6 = pnand %p525_p5, %p524_p3  ;;  %p530_p10 = scmp.lt.u32.totalorder %s528_s25, %s523_s16 }
  0x1c   : > { %p532_p12 = scmp.lt.u32.totalorder %s523_s16, %s737_s11 }
  0x1d   : > { %p527_p7 = pneg %p526_p6  ;;  %p531_p13 = por %p530_p10, %p529_p4 }
  0x1f   : > { %p533_p1 = por %p532_p12, %p531_p13 }
  0x21   : > { %p534_p2 = pnand %p533_p1, %p527_p7 }
  0x23   : > { %537 = shalt.err (!%p534_p2)
}
  0x24   : > { %s538_s6 = scalar_lea.vmem %s739_s13, 128  ;;  %s637_s7 = smov [#allocation4]  }
  0x25   : > { %p539_p3 = scmp.ne.s32.totalorder %s739_s13, %s538_s6  ;;  %s543_s8 = sshll.u32 %s637_s7, 4  ;;  %s544_s8 = int_to_ptr.vmem [resolvable:$false] %s543_s8 }
  0x26   : > { %s545_s9 = scalar_lea.vmem %s544_s8, 256  ;;  %p546_p9 = scmp.lt.s32.totalorder %s739_s13, %s544_s8 }
  0x27   : > { %p541_p6 = pnand %p539_p3, %p525_p5  ;;  %p547_p4 = scmp.lt.s32.totalorder %s545_s9, %s538_s6 }
  0x29   : > { %p542_p11 = pneg %p541_p6  ;;  %p548_p10 = por %p547_p4, %p546_p9 }
  0x2b   : > { %p549_p12 = pnand %p548_p10, %p542_p11 }
  0x2d   : > { %552 = shalt.err (!%p549_p12)
}
  0x2e   : > { %456 = dma.hbm_to_vmem [thread:$0]  (!%p743_p0), %s737_s11, 128, %s739_s13, %s160_s15  }
  0x2f   : > { %p864_p1 = scmp.lt.s32.totalorder %s635_s22, 3  ;;  %p865_p2 = scmp.ge.s32.totalorder %s635_s22, 1 }
  0x31   : > { %p192_p5 = pnand %p865_p2, %p864_p1 }
  0x32   : > { %s779_s10 = sand.u32 (!%p192_p5), 1, %s619_s18  }
  0x33   : > { %195 = sbr.rel (%p192_p5) target bundleno = 254 (0xfe), region = 32  ;;  %s435_s12 = sshll.u32 (!%p192_p5), %s779_s10, 3 }
  0x34   : > { %s198_s16 = scalar_lea.sflag (!%p192_p5), [#allocation5], %s779_s10  ;;  %s201_s0 = scalar_lea.vmem (!%p192_p5), [#allocation4], %s435_s12 }
  0x3a   : > { %606 = dma.done.wait (%p715_p8), %s198_s16, 128  }
  0x3b   : > { %608 = vsyncadd (%p715_p8), %s198_s16, 4294967168  ;;  %v638_v0 = vmov 0   ;;  %v247_v1 = vld [vmem:[%s854_s1] sm:$0xf]  ;;  %vm258_vm0 = vcmask 1043456   ;;  %s273_s28 = sld [smem:[#allocation3]] }
  0x3c   : > { %512 = vset.pattern.permute.xlu0 %v638_v0  ;;  %v245_v2 = vld [vmem:[%s201_s0] sm:$0xff]  ;;  %p235_p8 = scmp.lt.s32.totalorder %s627_s20, 1  ;;  %s436_s27 = sshll.u32 %s779_s10, 4 }
  0x3d   : > { %250 = vperm.xlu0 %512, %v247_v1   ;;  %v254_v3 = vcombine.high %v245_v2, %v245_v2  ;;  %s448_s6 = sshll.u32 %s627_s20, 8  ;;  %s232_s7 = scalar_lea.vmem [#allocation7], %s436_s27 }
  0x3e   : > { %s236_s14 = scalar_select %p235_p8, %s627_s20, 1 }
  0x3f   : > { %s325_s8 = sshll.u32 %s232_s7, 4  ;;  %s803_s16 = scalar_lea.hbm %s857_s4, %s448_s6  ;;  %s805_s8 = int_to_ptr.vmem [resolvable:$true] %s325_s8 }
  0x40   : > { %s447_s15 = sshll.u32 %s236_s14, 3  ;;  %s309_s20 = scalar_lea.sflag [#allocation6], %s779_s10 }
  0x41   : > { %v274_v19 = vstv %s273_s28  ;;  %s242_s26 = scalar_lea.vmem %s856_s3, %s447_s15  ;;  %s553_s0 = scalar_lea.vmem %s805_s8, 256 }
  0x42   : > { %v246_v30 = vld [vmem:[%s242_s26] sm:$0xff]  ;;  %p554_p9 = scmp.ne.s32.totalorder %s805_s8, %s553_s0  ;;  %p866_p11 = scmp.ne.s32.totalorder %s861_s29, 0 }
  0x43   : > { %v294_v32 = vcombine.high %v246_v30, %v246_v30  ;;  %s639_s11 = smov [#allocation7]  }
  0x44   : > { %p555_p0 = pnand %p554_p9, %p866_p11  ;;  %s557_s13 = sshll.u32 %s639_s11, 4  ;;  %s558_s13 = int_to_ptr.vmem [resolvable:$false] %s557_s13 }
  0x45   : > { %s559_s28 = scalar_lea.vmem %s558_s13, 512  ;;  %p560_p13 = scmp.lt.s32.totalorder %s805_s8, %s558_s13 }
  0x46   : > { %p556_p7 = pneg %p555_p0  ;;  %p561_p3 = scmp.lt.s32.totalorder %s559_s28, %s553_s0 }
  0x48   : > { %p562_p6 = por %p561_p3, %p560_p13 }
  0x4a   : > { %p563_p4 = pnand %p562_p6, %p556_p7 }
  0xbc   : > { %v251_v4 = vpop.permute.xlu0 %250 }
  0xbd   : > { %v256_v5 = vmul.f32 %v251_v4, %v245_v2  ;;  %v257_v6 = vmul.f32 %v254_v3, %v251_v4 }
  0xbf   : > { %v259_v7 = vsel %vm258_vm0, %v256_v5, 0.0  ;;  %v266_v8 = vsel %vm258_vm0, %v257_v6, 0.0 }
  0xc0   : > { %v260_v9 = vrot.slane %v259_v7, 4  ;;  %v267_v10 = vrot.slane %v266_v8, 4 }
  0xc2   : > { %v261_v11 = vadd.f32 %v260_v9, %v259_v7  ;;  %v268_v12 = vadd.f32 %v267_v10, %v266_v8 }
  0xc4   : > { %v262_v13 = vrot.slane %v261_v11, 2  ;;  %v269_v14 = vrot.slane %v268_v12, 2 }
  0xc6   : > { %v263_v15 = vadd.f32 %v262_v13, %v261_v11  ;;  %v270_v16 = vadd.f32 %v269_v14, %v268_v12 }
  0xc8   : > { %v264_v17 = vrot.slane %v263_v15, 1  ;;  %v271_v18 = vrot.slane %v270_v16, 1 }
  0xca   : > { %v265_v20 = vadd.f32 %v264_v17, %v263_v15  ;;  %v272_v21 = vadd.f32 %v271_v18, %v270_v16 }
  0xcc   : > { %v275_v22 = vadd.f32 %v274_v19, %v265_v20  ;;  %v276_v23 = vadd.f32 %v274_v19, %v272_v21 }
  0xce   : > { %v439_v24 = vmul.f32 -1.442695, %v275_v22  ;;  %v440_v25 = vmul.f32 -1.442695, %v276_v23 }
  0xd0   : > { %515 = vpow2.f32 %v439_v24 }
  0xd1   : > { %517 = vpow2.f32 %v440_v25 }
  0xda   : > { %v516_v26 = vpop.eup %515 }
  0xdb   : > { %v518_v27 = vpop.eup %517  ;;  %v283_v28 = vadd.f32 1.0, %v516_v26 }
  0xdc   : > { %v284_v29 = vadd.f32 1.0, %v518_v27 }
  0xdd   : > { %519 = vrcp.f32 %v283_v28 }
  0xde   : > { %521 = vrcp.f32 %v284_v29 }
  0xe7   : > { %v520_v31 = vpop.eup %519 }
  0xe8   : > { %v522_v33 = vpop.eup %521  ;;  %v289_v34 = vadd.f32 1.0, %v520_v31 }
  0xe9   : > { %v290_v35 = vadd.f32 1.0, %v522_v33 }
  0xea   : > { %v296_v36 = vmul.f32 %v289_v34, %v246_v30  ;;  %v291_v38 = vmul.f32 %v289_v34, %v245_v2 }
  0xeb   : > { %v297_v37 = vmul.f32 %v294_v32, %v290_v35  ;;  %v292_v40 = vmul.f32 %v290_v35, %v254_v3 }
  0xec   : > { %v300_v39 = vrot.slane %v296_v36, 4 }
  0xed   : > { %v301_v41 = vrot.slane %v297_v37, 4 }
  0xee   : > { %v304_v42 = vsel %vm258_vm0, %v291_v38, %v300_v39 }
  0xef   : > { %v305_v43 = vsel %vm258_vm0, %v292_v40, %v301_v41  ;;  %306 = vst [vmem:[%s232_s7] sm:$0xff] %v304_v42 }
  0xf0   : > { %307 = vst [vmem:[%s232_s7 + $0x8] sm:$0xff] %v305_v43 }
  0xf1   : > { %566 = shalt.err (!%p563_p4)
}
  0xf2   : > { %s567_s10 = scalar_lea.hbm %s803_s16, 256  ;;  %s571_s23 = scalar_lea.hbm %s857_s4, 512 }
  0xf3   : > { %p568_p10 = scmp.ne.s32.totalorder %s803_s16, %s567_s10  ;;  %p572_p2 = scmp.lt.u32.totalorder %s803_s16, %s857_s4 }
  0xf4   : > { %p573_p5 = scmp.lt.u32.totalorder %s571_s23, %s567_s10  ;;  %p575_p9 = scmp.lt.u32.totalorder %s567_s10, %s803_s16 }
  0xf5   : > { %p569_p12 = pnand %p568_p10, %p866_p11 }
  0xf6   : > { %p574_p8 = por %p573_p5, %p572_p2 }
  0xf7   : > { %p570_p1 = pneg %p569_p12 }
  0xf8   : > { %p576_p0 = por %p575_p9, %p574_p8 }
  0xfa   : > { %p577_p7 = pnand %p576_p0, %p570_p1 }
  0xfc   : > { %580 = shalt.err (!%p577_p7)
}
  0xfd   : > { %451 = dma.vmem_to_hbm [thread:$0]  (%p866_p11), %s805_s8, 256, %s803_s16, %s309_s20  }
  0xfe PF: > { %s337_s27 = sand.u32 1, %s615_s17   ;;  %p867_p13 = scmp.ne.s32.totalorder %s862_s5, 0 }
  0xff   : > { %p868_p3 = scmp.ge.s32.totalorder %s635_s22, 2  ;;  %s338_s6 = scalar_lea.sflag [#allocation6], %s337_s27 }
 0x101   : > { %p458_p6 = pnand %p868_p3, %p867_p13 }
 0x103   : > { %610 = dma.done.wait (!%p458_p6), %s338_s6, 256  }
 0x104   : > { %612 = vsyncadd (!%p458_p6), %s338_s6, 4294967040  ;;  %s21_s22 = sadd.s32 1, %s635_s22   ;;  %s869_s17 = smov %s619_s18 }
 0x105   : > { %p18_p4 = scmp.ge.s32.totalorder %s21_s22, 4   ;;  %s870_s18 = smov %s623_s19 }
 0x106   : > { %s871_s19 = smov %s724_s30  ;;  %s872_s20 = smov %s631_s21 }
 0x107   : > { %s873_s21 = smov %s875_s24  ;;  %20 = sbr.rel (!%p18_p4) target bundleno = 8 (0x8), region = 80 }
 0x10e   :  { %343 = vsyncpa [#allocation5], 1 }
 0x10f   :  { %345 = vsyncpa [#allocation5 + $0x1], 1 }
 0x110   :  { %346 = vsyncpa [#allocation6], 1 }
 0x111   :  { %348 = vsyncpa [#allocation6 + $0x1], 1 }

</bundles_post_ra>
